<compile_context>
chip_gen: v7x
topology: tpu7x:2x2x1
jax: 0.10.0
libtpu: 0.0.40
codegen_flags: <defaults>
</compile_context>

<pallas_src>
import functools

import jax
import jax.numpy as jnp
from jax import lax
from jax.experimental import pallas as pl
from jax.experimental.pallas import tpu as pltpu

H1, H2 = 256, 128     # hidden sizes from the PyTorch module
LANE = 128            # TPU lane width
ROW = 16              # bf16 sublane packing granularity


def _round_up(v, m):
    return ((v + m - 1) // m) * m


def dqn_kernel(x_ref, w1_ref, b1_ref, w2_ref, b2_ref, w3_ref, b3_ref, o_ref):
    # In-kernel cast: read x once as f32 from HBM, cast on the VPU (hides
    # under MXU/DMA slack), feed bf16 to the MXU.
    x = x_ref[...].astype(jnp.bfloat16)

    # Layer 1: (Bt, D_in) @ (D_in, 256) + (1, 256), ReLU (f32 accumulate)
    h1 = jnp.dot(x, w1_ref[...], preferred_element_type=jnp.float32)
    h1 = jnp.maximum(h1 + b1_ref[...], 0.0).astype(jnp.bfloat16)

    # Layer 2: (Bt, 256) @ (256, 128) + (1, 128), ReLU
    h2 = jnp.dot(h1, w2_ref[...], preferred_element_type=jnp.float32)
    h2 = jnp.maximum(h2 + b2_ref[...], 0.0).astype(jnp.bfloat16)

    # Layer 3: (Bt, 128) @ (128, D_out_pad) + (1, D_out_pad) — lane-dense store
    h3 = jnp.dot(h2, w3_ref[...], preferred_element_type=jnp.float32)
    o_ref[...] = (h3 + b3_ref[...]).astype(o_ref.dtype)


def prepare_params(params):
    """One-time parameter prep (call at init / after each optimizer step):
    bf16 weights, f32 biases, output feature axis padded to a lane-dense 128."""
    w1, b1, w2, b2, w3, b3 = params
    d_out = w3.shape[1]
    d_out_pad = max(LANE, _round_up(d_out, LANE))
    w3p = jnp.zeros((w3.shape[0], d_out_pad), w3.dtype).at[:, :d_out].set(w3)
    b3p = jnp.zeros((1, d_out_pad), jnp.float32).at[:, :d_out].set(
        b3.astype(jnp.float32).reshape(1, d_out))
    prepped = (
        w1.astype(jnp.bfloat16), b1.astype(jnp.float32).reshape(1, H1),
        w2.astype(jnp.bfloat16), b2.astype(jnp.float32).reshape(1, H2),
        w3p.astype(jnp.bfloat16), b3p,
    )
    return prepped, d_out


def _plan_batch(B, b_tile):
    """Pick (B_pad, tile): rows rounded to 16 (bf16 sublane packing); keep the
    tile that divides B_pad; ensure >=2 grid steps when there's enough work so
    v7x's second TensorCore is fed."""
    B_pad = _round_up(max(B, ROW), ROW)
    tile = min(_round_up(b_tile, ROW), B_pad)
    if B_pad > ROW and B_pad // tile < 2:
        tile = max(ROW, _round_up(B_pad // 2, ROW))
    B_pad = _round_up(B_pad, tile)
    return B_pad, tile


def dqn_forward(x, prepped, d_out, *, b_tile=1024, slice_output=True):
    """Fused DQN forward.

    x: (B, D_in) f32. `prepped` from prepare_params (persisted across calls).
    slice_output=False returns the lane-padded (B_pad, 128) Q slab (skips the
    wrapper slice pass; argmax / gather-by-action work fine on it)."""
    w1_bf, b1f, w2_bf, b2f, w3_bf, b3f = prepped
    B, D_in = x.shape
    d_out_pad = w3_bf.shape[1]

    B_pad, tile = _plan_batch(B, b_tile)
    if B_pad != B:
        x = jnp.zeros((B_pad, D_in), x.dtype).at[:B].set(x)

    grid = (B_pad // tile,)

    def resident(shape):
        # Same block every grid step -> weights/biases stay VMEM-resident.
        return pl.BlockSpec(shape, lambda i: (0, 0))

    flops = 2 * B_pad * (D_in * H1 + H1 * H2 + H2 * d_out_pad)
    bytes_accessed = (
        x.size * x.dtype.itemsize
        + (w1_bf.size + w2_bf.size + w3_bf.size) * 2
        + (b1f.size + b2f.size + b3f.size) * 4
        + B_pad * d_out_pad * 4
    )

    # Rough VMEM footprint: double-buffered x/out tiles + (conservatively
    # double-buffered) resident weights + f32 intermediates.
    footprint = (
        2 * tile * (D_in + d_out_pad) * 4
        + 2 * (w1_bf.size + w2_bf.size + w3_bf.size) * 2
        + 2 * (b1f.size + b2f.size + b3f.size) * 4
        + tile * (H1 + H2) * 4
    )
    cp_kwargs = dict(dimension_semantics=("parallel",))
    if footprint > (12 << 20):
        # v5e's scoped-VMEM default is 16 MiB; raise it only when needed.
        cp_kwargs["vmem_limit_bytes"] = int(
            min(max(32 << 20, footprint + (8 << 20)), 64 << 20))

    out_padded = pl.pallas_call(
        dqn_kernel,
        out_shape=jax.ShapeDtypeStruct((B_pad, d_out_pad), jnp.float32),
        grid=grid,
        in_specs=[
            pl.BlockSpec((tile, D_in), lambda i: (i, 0)),
            resident(w1_bf.shape), resident(b1f.shape),
            resident(w2_bf.shape), resident(b2f.shape),
            resident(w3_bf.shape), resident(b3f.shape),
        ],
        out_specs=pl.BlockSpec((tile, d_out_pad), lambda i: (i, 0)),
        compiler_params=pltpu.CompilerParams(**cp_kwargs),
        cost_estimate=pl.CostEstimate(
            flops=flops, transcendentals=0, bytes_accessed=bytes_accessed),
    )(x, w1_bf, b1f, w2_bf, b2f, w3_bf, b3f)

    if not slice_output:
        return out_padded              # (B_pad, 128) lane-padded Q slab
    return out_padded[:B, :d_out]


def init_params(key, input_dim, output_dim):
    """Deterministic init mimicking nn.Linear's uniform(-1/sqrt(fan_in), ...)."""
    dims = [(input_dim, H1), (H1, H2), (H2, output_dim)]
    params = []
    for i, (fan_in, fan_out) in enumerate(dims):
        kw, kb = jax.random.split(jax.random.fold_in(key, i))
        bound = 1.0 / jnp.sqrt(float(fan_in))
        # weight stored as (in, out) = PyTorch weight.T
        w = jax.random.uniform(kw, (fan_in, fan_out), jnp.float32, -bound, bound)
        b = jax.random.uniform(kb, (1, fan_out), jnp.float32, -bound, bound)
        params.extend([w, b])
    return tuple(params)


def reference_forward(x, params):
    """Pure-JAX reference mimicking the kernel's bf16-input / f32-accumulate
    numerics (inputs & intermediates rounded to bf16, exact f32 matmuls)."""
    w1, b1, w2, b2, w3, b3 = params
    bf = lambda a: a.astype(jnp.bfloat16).astype(jnp.float32)
    hp = lax.Precision.HIGHEST
    h1 = jnp.maximum(jnp.dot(bf(x), bf(w1), precision=hp) + b1, 0.0)
    h2 = jnp.maximum(jnp.dot(bf(h1), bf(w2), precision=hp) + b2, 0.0)
    return jnp.dot(bf(h2), bf(w3), precision=hp) + b3


if __name__ == "__main__":
    key = jax.random.PRNGKey(0)
    batch, input_dim, output_dim = 8, 32, 8

    kx, kp = jax.random.split(key)
    x = jax.random.normal(kx, (batch, input_dim), jnp.float32)
    params = init_params(kp, input_dim, output_dim)

    # One-time cast/pad of parameters (not per forward call).
    prepped, d_out = prepare_params(params)

    fwd = jax.jit(functools.partial(dqn_forward, prepped=prepped, d_out=d_out))
    out = jax.block_until_ready(fwd(x))

    ref = reference_forward(x, params)
    assert out.shape == (batch, output_dim)
    assert jnp.allclose(out, ref, atol=2e-3, rtol=2e-3), "mismatch vs reference"

    print("KERNEL_OK")
</pallas_src>

<mosaic_0001>
module attributes {stable_mosaic.version = 11 : i64} {
  func.func @dqn_kernel(%arg0: i32, %arg1: memref<16x32xf32, #tpu.memory_space<vmem>>, %arg2: memref<32x256xbf16, #tpu.memory_space<vmem>>, %arg3: memref<1x256xf32, #tpu.memory_space<vmem>>, %arg4: memref<256x128xbf16, #tpu.memory_space<vmem>>, %arg5: memref<1x128xf32, #tpu.memory_space<vmem>>, %arg6: memref<128x128xbf16, #tpu.memory_space<vmem>>, %arg7: memref<1x128xf32, #tpu.memory_space<vmem>>, %arg8: memref<16x128xf32, #tpu.memory_space<vmem>>) attributes {dimension_semantics = [#tpu.dimension_semantics<parallel>], iteration_bounds = array<i64: 1>, scalar_prefetch = 0 : i64, scratch_operands = 0 : i64, tpu.core_type = #tpu.core_type<tc>, window_params = [{transform_indices = @transform_0, window_bounds = array<i64: 16, 32>}, {pipeline_mode = #tpu.pipeline_mode<synchronous>, transform_indices = @transform_1, window_bounds = array<i64: 32, 256>}, {pipeline_mode = #tpu.pipeline_mode<synchronous>, transform_indices = @transform_2, window_bounds = array<i64: 1, 256>}, {pipeline_mode = #tpu.pipeline_mode<synchronous>, transform_indices = @transform_3, window_bounds = array<i64: 256, 128>}, {pipeline_mode = #tpu.pipeline_mode<synchronous>, transform_indices = @transform_4, window_bounds = array<i64: 1, 128>}, {pipeline_mode = #tpu.pipeline_mode<synchronous>, transform_indices = @transform_5, window_bounds = array<i64: 128, 128>}, {pipeline_mode = #tpu.pipeline_mode<synchronous>, transform_indices = @transform_6, window_bounds = array<i64: 1, 128>}, {transform_indices = @transform_7, window_bounds = array<i64: 16, 128>}]} {
    %c0 = arith.constant 0 : index
    %c0_0 = arith.constant 0 : index
    %0 = vector.load %arg1[%c0, %c0_0] : memref<16x32xf32, #tpu.memory_space<vmem>>, vector<16x32xf32>
    %1 = arith.truncf %0 : vector<16x32xf32> to vector<16x32xbf16>
    %c0_1 = arith.constant 0 : index
    %c0_2 = arith.constant 0 : index
    %2 = vector.load %arg2[%c0_1, %c0_2] : memref<32x256xbf16, #tpu.memory_space<vmem>>, vector<32x256xbf16>
    %cst = arith.constant dense<0.000000e+00> : vector<16x256xf32>
    %3 = tpu.matmul %1, %2, %cst {dimension_numbers = #tpu.dot_dimension_numbers<[1], [0], [0], [1], [0, 0, 1, 1], [], []>} : vector<16x32xbf16>, vector<32x256xbf16>, vector<16x256xf32> -> vector<16x256xf32>
    %c0_3 = arith.constant 0 : index
    %c0_4 = arith.constant 0 : index
    %4 = vector.load %arg3[%c0_3, %c0_4] : memref<1x256xf32, #tpu.memory_space<vmem>>, vector<1x256xf32>
    %5 = vector.broadcast %4 : vector<1x256xf32> to vector<16x256xf32>
    %6 = arith.addf %3, %5 : vector<16x256xf32>
    %cst_5 = arith.constant 0.000000e+00 : f32
    %7 = vector.broadcast %cst_5 : f32 to vector<16x256xf32>
    %8 = arith.maximumf %6, %7 : vector<16x256xf32>
    %9 = arith.truncf %8 : vector<16x256xf32> to vector<16x256xbf16>
    %c0_6 = arith.constant 0 : index
    %c0_7 = arith.constant 0 : index
    %10 = vector.load %arg4[%c0_6, %c0_7] : memref<256x128xbf16, #tpu.memory_space<vmem>>, vector<256x128xbf16>
    %cst_8 = arith.constant dense<0.000000e+00> : vector<16x128xf32>
    %11 = tpu.matmul %9, %10, %cst_8 {dimension_numbers = #tpu.dot_dimension_numbers<[1], [0], [0], [1], [0, 0, 1, 1], [], []>} : vector<16x256xbf16>, vector<256x128xbf16>, vector<16x128xf32> -> vector<16x128xf32>
    %c0_9 = arith.constant 0 : index
    %c0_10 = arith.constant 0 : index
    %12 = vector.load %arg5[%c0_9, %c0_10] : memref<1x128xf32, #tpu.memory_space<vmem>>, vector<1x128xf32>
    %13 = vector.broadcast %12 : vector<1x128xf32> to vector<16x128xf32>
    %14 = arith.addf %11, %13 : vector<16x128xf32>
    %cst_11 = arith.constant 0.000000e+00 : f32
    %15 = vector.broadcast %cst_11 : f32 to vector<16x128xf32>
    %16 = arith.maximumf %14, %15 : vector<16x128xf32>
    %17 = arith.truncf %16 : vector<16x128xf32> to vector<16x128xbf16>
    %c0_12 = arith.constant 0 : index
    %c0_13 = arith.constant 0 : index
    %18 = vector.load %arg6[%c0_12, %c0_13] : memref<128x128xbf16, #tpu.memory_space<vmem>>, vector<128x128xbf16>
    %cst_14 = arith.constant dense<0.000000e+00> : vector<16x128xf32>
    %19 = tpu.matmul %17, %18, %cst_14 {dimension_numbers = #tpu.dot_dimension_numbers<[1], [0], [0], [1], [0, 0, 1, 1], [], []>} : vector<16x128xbf16>, vector<128x128xbf16>, vector<16x128xf32> -> vector<16x128xf32>
    %c0_15 = arith.constant 0 : index
    %c0_16 = arith.constant 0 : index
    %20 = vector.load %arg7[%c0_15, %c0_16] : memref<1x128xf32, #tpu.memory_space<vmem>>, vector<1x128xf32>
    %21 = vector.broadcast %20 : vector<1x128xf32> to vector<16x128xf32>
    %22 = arith.addf %19, %21 : vector<16x128xf32>
    %c0_17 = arith.constant 0 : index
    %c0_18 = arith.constant 0 : index
    %23 = vector.load %arg8[%c0_17, %c0_18] : memref<16x128xf32, #tpu.memory_space<vmem>>, vector<16x128xf32>
    tpu.vector_store %arg8[%c0_17, %c0_18], %22 {strides = array<i32>} : memref<16x128xf32, #tpu.memory_space<vmem>>, vector<16x128xf32>,
    return
  }
  func.func @transform_0(%arg0: i32) -> (i32, i32) {
    %c0_i32 = arith.constant 0 : i32
    %c0_i32_0 = arith.constant 0 : i32
    return %arg0, %c0_i32 : i32, i32
  }
  func.func @transform_1(%arg0: i32) -> (i32, i32) {
    %c0_i32 = arith.constant 0 : i32
    %c0_i32_0 = arith.constant 0 : i32
    %c0_i32_1 = arith.constant 0 : i32
    return %c0_i32, %c0_i32_0 : i32, i32
  }
  func.func @transform_2(%arg0: i32) -> (i32, i32) {
    %c0_i32 = arith.constant 0 : i32
    %c0_i32_0 = arith.constant 0 : i32
    %c0_i32_1 = arith.constant 0 : i32
    return %c0_i32, %c0_i32_0 : i32, i32
  }
  func.func @transform_3(%arg0: i32) -> (i32, i32) {
    %c0_i32 = arith.constant 0 : i32
    %c0_i32_0 = arith.constant 0 : i32
    %c0_i32_1 = arith.constant 0 : i32
    return %c0_i32, %c0_i32_0 : i32, i32
  }
  func.func @transform_4(%arg0: i32) -> (i32, i32) {
    %c0_i32 = arith.constant 0 : i32
    %c0_i32_0 = arith.constant 0 : i32
    %c0_i32_1 = arith.constant 0 : i32
    return %c0_i32, %c0_i32_0 : i32, i32
  }
  func.func @transform_5(%arg0: i32) -> (i32, i32) {
    %c0_i32 = arith.constant 0 : i32
    %c0_i32_0 = arith.constant 0 : i32
    %c0_i32_1 = arith.constant 0 : i32
    return %c0_i32, %c0_i32_0 : i32, i32
  }
  func.func @transform_6(%arg0: i32) -> (i32, i32) {
    %c0_i32 = arith.constant 0 : i32
    %c0_i32_0 = arith.constant 0 : i32
    %c0_i32_1 = arith.constant 0 : i32
    return %c0_i32, %c0_i32_0 : i32, i32
  }
  func.func @transform_7(%arg0: i32) -> (i32, i32) {
    %c0_i32 = arith.constant 0 : i32
    %c0_i32_0 = arith.constant 0 : i32
    return %arg0, %c0_i32 : i32, i32
  }
}

</mosaic_0001>

<bundles_post_ra>
// kernel: dqn_forward.1
= control target key start
LH: loop header
LB: loop body
LE: loop exit
PB: predicated region body
PF: predicated region fallthrough
CT: control target
= control target key end

     0   :  { %12 = vsyncpa [#allocation3], 0  ;;  %s573_s24 = smov [#allocation2]   ;;  %s688_s0 = inlined_call_operand.vmem [shape: f32[16,32], index: 0, kind: input, shape index: {}]   ;;  %s689_s1 = inlined_call_operand.vmem [shape: bf16[32,256], index: 1, kind: input, shape index: {}]   ;;  %s690_s2 = inlined_call_operand.vmem [shape: f32[1,256], index: 2, kind: input, shape index: {}]   ;;  %s691_s3 = inlined_call_operand.hbm [shape: bf16[256,128], index: 3, kind: input, shape index: {}]   ;;  %s692_s4 = inlined_call_operand.vmem [shape: f32[1,128], index: 4, kind: input, shape index: {}]   ;;  %s693_s5 = inlined_call_operand.vmem [shape: bf16[128,128], index: 5, kind: input, shape index: {}]   ;;  %s694_s6 = inlined_call_operand.vmem [shape: f32[1,128], index: 6, kind: input, shape index: {}]   ;;  %s695_s7 = inlined_call_operand.vmem [shape: f32[16,128], index: 7, kind: output, shape index: {}]  }
   0x1   :  { %s24_s25 = sshll.u32 %s573_s24, 4  ;;  %s549_s28 = scalar_lea.hbm %s691_s3, 2048  ;;  %s25_s25 = int_to_ptr.vmem [resolvable:$true] %s24_s25 }
   0x2   :  { %p550_p0 = scmp.ne.s32.totalorder %s691_s3, %s549_s28  ;;  %p553_p1 = scmp.lt.u32.totalorder %s549_s28, %s691_s3 }
   0x4   :  { %p555_p2 = pnand %p553_p1, %p550_p0 }
   0x6   :  { %558 = shalt.err (!%p555_p2)
}
   0x7   :  { %s559_s10 = scalar_lea.vmem %s25_s25, 2048  ;;  %p564_p4 = scmp.lt.s32.totalorder %s25_s25, %s25_s25 }
   0x8   :  { %p560_p3 = scmp.ne.s32.totalorder %s25_s25, %s559_s10  ;;  %p565_p5 = scmp.lt.s32.totalorder %s559_s10, %s559_s10 }
   0xa   :  { %p566_p6 = por %p565_p5, %p564_p4 }
   0xc   :  { %p567_p7 = pnand %p566_p6, %p560_p3 }
   0xe   :  { %570 = shalt.err (!%p567_p7)
}
   0xf   :  { %s574_s11 = smov 64   ;;  %s575_s12 = smov 4  }
  0x10   :  { %30 = dma.hbm_to_vmem [thread:$0]  %s691_s3, 2048, %s25_s25, [#allocation3], %s574_s11, %s574_s11, %s575_s12  }
  0x11   :  { %571 = dma.done.wait [#allocation3], 2048  }
  0x12   :  { %572 = vsyncadd [#allocation3], 4294965248  ;;  %v576_v0 = vmov 0   ;;  %v519_v1 = vld [vmem:[%s689_s1 + $0x4] ss:$8 sps:$4 sm:$0xff]   ;;  %vm80_vm0 = vcmask 261120   ;;  %v50_v30 = vlaneseq }
  0x13   :  { %116 = vmatprep.mubr.bf16.mxu0 %v576_v0  ;;  %v521_v2 = vld [vmem:[%s689_s1] ss:$8 sps:$4 sm:$0xff]   ;;  %84 = vmatprep.subr.bf16.mxu0 %v519_v1  ;;  %v522_v3 = vld [vmem:[%s689_s1 + $0x14] ss:$8 sps:$4 sm:$0xff]   ;;  %v524_v4 = vld [vmem:[%s689_s1 + $0x10] ss:$8 sps:$4 sm:$0xff]  }
  0x14   :  { %v41_v5 = vld [vmem:[%s688_s0] sm:$0xff]  ;;  %85 = vmatpush1.bf16.msra.mxu0 %v521_v2  ;;  %v42_v6 = vld [vmem:[%s688_s0 + $0x8] sm:$0xff]  ;;  %v529_v12 = vld [vmem:[#allocation2 + $0x50] sm:$0xff]   ;;  %v577_v25 = vmov 0.0   ;;  %v51_v31 = vshrl.u32 %v50_v30, 7  ;;  %vm578_vm1 = vmmov 0  }
  0x15   :  { %86 = vmatprep.subr.bf16.mxu0 %v522_v3  ;;  %v525_v7 = vld [vmem:[#allocation2 + $0x40] sm:$0xff]   ;;  %v43_v9 = vpack.c.bf16 %v42_v6, %v41_v5  ;;  %v527_v10 = vld [vmem:[#allocation2 + $0x48] sm:$0xff]   ;;  %v530_v13 = vld [vmem:[#allocation2 + $0x10] sm:$0xff]  }
  0x16   :  { %v526_v8 = vld [vmem:[#allocation2] sm:$0xff]   ;;  %462 = vmatprep.subr.bf16.mxu1 %v525_v7  ;;  %v528_v11 = vld [vmem:[#allocation2 + $0x8] sm:$0xff]   ;;  %v531_v14 = vld [vmem:[#allocation2 + $0x58] sm:$0xff]   ;;  %v52_v32 = vsub.s32 0, %v51_v31  ;;  %v56_v34 = vsub.s32 1, %v51_v31 }
  0x17   :  { %463 = vmatpush3.bf16.msra.mxu1 %v526_v8  ;;  %v532_v15 = vld [vmem:[#allocation2 + $0x18] sm:$0xff]   ;;  %v533_v16 = vld [vmem:[#allocation2 + $0x60] sm:$0xff]   ;;  %v535_v18 = vld [vmem:[#allocation2 + $0x68] sm:$0xff]  }
  0x18   :  { %87 = vmatpush1.bf16.msra.mxu0 %v524_v4  ;;  %464 = vmatprep.subr.bf16.mxu1 %v527_v10  ;;  %v534_v17 = vld [vmem:[#allocation2 + $0x20] sm:$0xff]   ;;  %v536_v19 = vld [vmem:[#allocation2 + $0x28] sm:$0xff]   ;;  %v537_v20 = vld [vmem:[#allocation2 + $0x70] sm:$0xff]  }
  0x19   :  { %v538_v21 = vld [vmem:[#allocation2 + $0x30] sm:$0xff]   ;;  %v539_v22 = vld [vmem:[#allocation2 + $0x78] sm:$0xff]   ;;  %v541_v24 = vld [vmem:[%s693_s5] sm:$0xff]   ;;  %493 = vmatprep.subr.bf16.mxu0 %v577_v25 }
  0x1a   :  { %v540_v23 = vld [vmem:[#allocation2 + $0x38] sm:$0xff]   ;;  %v542_v26 = vld [vmem:[%s693_s5 + $0x8] sm:$0xff]   ;;  %v543_v27 = vld [vmem:[%s693_s5 + $0x10] sm:$0xff]  }
  0x1b   :  { %435 = vmatmul.mubr.msk.bf16.vlgmr.msra.gmra.mrb[0].mxu0 %vm80_vm0, %v43_v9  ;;  %465 = vmatpush3.bf16.msra.mxu1 %v528_v11  ;;  %v544_v28 = vld [vmem:[%s693_s5 + $0x18] sm:$0xff]   ;;  %v545_v29 = vld [vmem:[%s693_s5 + $0x20] sm:$0xff]   ;;  %v546_v51 = vld [vmem:[%s693_s5 + $0x28] sm:$0xff]  }
  0x1c   :  { %466 = vmatprep.subr.bf16.mxu1 %v529_v12  ;;  %494 = vmatpush3.bf16.msra.mxu0 %v541_v24  ;;  %v48_v33 = vld [vmem:[%s690_s2] sm:$0x3]  ;;  %v547_v52 = vld [vmem:[%s693_s5 + $0x30] sm:$0xff]   ;;  %v548_v53 = vld [vmem:[%s693_s5 + $0x38] sm:$0xff]  }
  0x1d   :  { %495 = vmatprep.subr.bf16.mxu0 %v577_v25  ;;  %v53_v35 = vrot.slane %v48_v33, %v52_v32  ;;  %v57_v36 = vrot.slane %v48_v33, %v56_v34  ;;  %509 = vmatprep.mubr.msk.bf16.mxu0 %vm578_vm1, %v577_v25  ;;  %v436_v55 = vld [vmem:[%s692_s4] ss:$0 sm:$0xff] }
  0x1e   :  { %v453_v2 = vld [vmem:[%s694_s6] ss:$0 sm:$0xff] }
  0x1f   :  { %467 = vmatpush3.bf16.msra.mxu1 %v530_v13 }
  0x20   :  { %468 = vmatprep.subr.bf16.mxu1 %v531_v14  ;;  %496 = vmatpush3.bf16.msra.mxu0 %v542_v26 }
  0x21   :  { %497 = vmatprep.subr.bf16.mxu0 %v577_v25 }
  0x23   :  { %469 = vmatpush3.bf16.msra.mxu1 %v532_v15 }
  0x24   :  { %470 = vmatprep.subr.bf16.mxu1 %v533_v16  ;;  %498 = vmatpush3.bf16.msra.mxu0 %v543_v27 }
  0x25   :  { %499 = vmatprep.subr.bf16.mxu0 %v577_v25 }
  0x27   :  { %471 = vmatpush3.bf16.msra.mxu1 %v534_v17 }
  0x28   :  { %472 = vmatprep.subr.bf16.mxu1 %v535_v18  ;;  %500 = vmatpush3.bf16.msra.mxu0 %v544_v28 }
  0x29   :  { %501 = vmatprep.subr.bf16.mxu0 %v577_v25 }
  0x2b   :  { %473 = vmatpush3.bf16.msra.mxu1 %v536_v19 }
  0x2c   :  { %474 = vmatprep.subr.bf16.mxu1 %v537_v20  ;;  %502 = vmatpush3.bf16.msra.mxu0 %v545_v29 }
  0x2d   :  { %503 = vmatprep.subr.bf16.mxu0 %v577_v25 }
  0x2f   :  { %475 = vmatpush3.bf16.msra.mxu1 %v538_v21 }
  0x30   :  { %476 = vmatprep.subr.bf16.mxu1 %v539_v22  ;;  %504 = vmatpush3.bf16.msra.mxu0 %v546_v51 }
  0x31   :  { %505 = vmatprep.subr.bf16.mxu0 %v577_v25 }
  0x33   :  { %477 = vmatpush3.bf16.msra.mxu1 %v540_v23 }
  0x34   :  { %506 = vmatpush3.bf16.msra.mxu0 %v547_v52 }
  0x35   :  { %507 = vmatprep.subr.bf16.mxu0 %v577_v25 }
  0x38   :  { %508 = vmatpush3.bf16.msra.mxu0 %v548_v53 }
  0xee   :  { %v118_v37 = vpop.f32.mrb[0].mxu0 }
  0xef   :  { %v119_v38 = vadd.f32 %v118_v37, %v53_v35  ;;  %v120_v39 = vpop.f32.mrb[1].mxu0 }
  0xf0   :  { %v121_v40 = vadd.f32 %v120_v39, %v57_v36  ;;  %v122_v41 = vpop.f32.mrb[2].mxu0 }
  0xf1   :  { %v123_v42 = vadd.f32 %v122_v41, %v53_v35  ;;  %v124_v43 = vpop.f32.mrb[3].mxu0  ;;  %v127_v45 = vmax.f32 %v119_v38, 0.0 }
  0xf2   :  { %v125_v44 = vadd.f32 %v124_v43, %v57_v36  ;;  %v128_v47 = vmax.f32 %v121_v40, 0.0 }
  0xf3   :  { %v129_v46 = vmax.f32 %v123_v42, 0.0 }
  0xf4   :  { %v130_v48 = vmax.f32 %v125_v44, 0.0 }
  0xf5   :  { %v131_v49 = vpack.c.bf16 %v129_v46, %v127_v45 }
  0xf6   :  { %v132_v50 = vpack.c.bf16 %v130_v48, %v128_v47 }
  0xf8   :  { %300 = vmatprep.mubr.bf16.mxu1 %v132_v50 }
  0xf9   :  { %301 = vmatmul.mubr.bf16.vlgmr.msra.gmra.mrb[0].mxu1 %v131_v49 }
 0x1cc   :  { %v478_v54 = vpop.f32.mrb[0].mxu1 }
 0x1cd   :  { %v479_v56 = vpop.f32.mrb[1].mxu1 }
 0x1ce   :  { %v480_v57 = vadd.f32 %v479_v56, %v478_v54  ;;  %v481_v58 = vpop.f32.mrb[2].mxu1 }
 0x1cf   :  { %v482_v59 = vpop.f32.mrb[3].mxu1 }
 0x1d0   :  { %v303_v60 = vadd.f32 %v480_v57, %v436_v55  ;;  %v483_v61 = vadd.f32 %v482_v59, %v481_v58 }
 0x1d2   :  { %v306_v62 = vadd.f32 %v483_v61, %v436_v55  ;;  %v309_v63 = vmax.f32 %v303_v60, 0.0 }
 0x1d4   :  { %v310_v0 = vmax.f32 %v306_v62, 0.0 }
 0x1d6   :  { %v311_v1 = vpack.c.bf16 %v310_v0, %v309_v63 }
 0x1d8   :  { %510 = vmatmul.mubr.bf16.vlgmr.msra.gmra.mrb[4].mxu0 %v311_v1 }
 0x2ab   :  { %v417_v3 = vpop.f32.mrb[4].mxu0 }
 0x2ac   :  { %v418_v4 = vadd.f32 %v453_v2, %v417_v3  ;;  %v511_v5 = vpop.f32.mrb[5].mxu0 }
 0x2ad   :  { %v420_v6 = vpop.f32.mrb[6].mxu0 }
 0x2ae   :  { %424 = vst [vmem:[%s695_s7] sm:$0xff] %v418_v4  ;;  %v421_v7 = vadd.f32 %v453_v2, %v420_v6  ;;  %v512_v8 = vpop.f32.mrb[7].mxu0 }
 0x2b0   :  { %425 = vst [vmem:[%s695_s7 + $0x8] sm:$0xff] %v421_v7 }
 0x2b1   :  { %430 = vsyncpa [#allocation3], 1 }

</bundles_post_ra>
